<compile_context>
chip_gen: v7x
topology: tpu7x:2x2x1
jax: 0.10.0
libtpu: 0.0.40
codegen_flags: <defaults>
</compile_context>

<pallas_src>
import math
import functools

import jax
import jax.numpy as jnp
from jax.experimental import pallas as pl
from jax.experimental.pallas import tpu as pltpu


def _refinement_kernel(x_ref, wk_ref, wv_ref, out_ref, k_acc, v_acc,
                       *, tk, lane_blk, d_k, n_true):
    jstep = pl.program_id(0)          # output-lane block (parallel, v7x TCs)
    kstep = pl.program_id(1)          # contraction step   (arbitrary)

    @pl.when(kstep == 0)
    def _init():
        k_acc[...] = jnp.zeros_like(k_acc)
        v_acc[...] = jnp.zeros_like(v_acc)

    # Contraction tile sliced from the VMEM-resident x block; bf16 x bf16
    # inputs go straight to the MXU fast path with f32 accumulation.
    xt = x_ref[:, pl.ds(pl.multiple_of(kstep * tk, 128), tk)].astype(jnp.bfloat16)
    k_acc[...] += jnp.dot(xt, wk_ref[...], preferred_element_type=jnp.float32)
    v_acc[...] += jnp.dot(xt, wv_ref[...], preferred_element_type=jnp.float32)

    @pl.when(kstep == pl.num_programs(1) - 1)
    def _epilogue():
        kq = k_acc[...]                       # [n_pad, dk_pad]  (key == query)
        n_pad = kq.shape[0]

        # Attention logits: query @ key^T / sqrt(d_k), no explicit transpose.
        s = jax.lax.dot_general(kq, kq, (((1,), (1,)), ((), ())),
                                preferred_element_type=jnp.float32)
        s = s * (1.0 / math.sqrt(d_k))

        if n_pad > n_true:   # keep zero-padded key rows out of the softmax
            col = jax.lax.broadcasted_iota(jnp.int32, s.shape, 1)
            s = jnp.where(col < n_true, s, -1e30)

        # Softmax over dim=1 (keys).  (Padded query rows, if any, produce
        # finite garbage that is sliced off by the wrapper.)
        m = jnp.max(s, axis=-1, keepdims=True)
        p = jnp.exp(s - m)
        p = p * pl.reciprocal(jnp.sum(p, axis=-1, keepdims=True), approx=True)

        # Attention output (this lane block) + ReLU.
        w = jnp.dot(p, v_acc[...], preferred_element_type=jnp.float32)
        w = jnp.maximum(w, 0.0)
        # TODO(synk): Dropout(p=0.7) is identity here (eval-mode semantics only).

        # Residual add for this lane block; LayerNorm happens in the wrapper
        # (it needs the full row, which a lane-split kernel block doesn't see).
        xr = x_ref[:, pl.ds(pl.multiple_of(jstep * lane_blk, 128), lane_blk)]
        out_ref[...] = (xr.astype(jnp.float32) + w).astype(out_ref.dtype)


def _round_up(v, m):
    return ((v + m - 1) // m) * m


def _pad2(a, rows, cols):
    pr, pc = rows - a.shape[0], cols - a.shape[1]
    if pr or pc:
        a = jnp.pad(a, ((0, pr), (0, pc)))
    return a


def _tpu_vmem_bytes():
    """Per-TensorCore VMEM capacity (best effort; defaults to 128 MiB)."""
    try:
        return int(pltpu.get_tpu_info().vmem_capacity_bytes)
    except Exception:
        pass
    try:
        if "7" in jax.devices()[0].device_kind.lower():
            return 64 * 1024 * 1024           # v7x-class
    except Exception:
        pass
    return 128 * 1024 * 1024


def refinement(x, wk, wv, gamma, beta, *, eps=1e-5, tk=None,
               num_lane_blocks=None, vmem_limit_bytes=None):
    """One SSAR refinement step, streamed over the D_sp contraction dim."""
    n, d_sp = x.shape
    d_k = wk.shape[1]

    vmem_cap = _tpu_vmem_bytes()
    small_vmem = vmem_cap <= 96 * 1024 * 1024      # v7x-class (64 MiB / TC)
    if num_lane_blocks is None:
        # v7x: split the dominant wv column stream across the two TensorCores.
        num_lane_blocks = 2 if small_vmem else 1
    if tk is None:
        tk = 1024 if small_vmem else 2048
        tk = min(tk, _round_up(d_sp, 128))
    assert tk % 128 == 0
    if vmem_limit_bytes is None:
        vmem_limit_bytes = int(max(32 * 1024 * 1024,
                                   min(96 * 1024 * 1024,
                                       vmem_cap - 12 * 1024 * 1024)))

    n_pad = _round_up(n, 8)
    dk_pad = _round_up(d_k, 128)
    # Lane padding decoupled from contraction-tile padding (bandwidth win).
    d_lane_pad = _round_up(d_sp, 128 * num_lane_blocks)
    lane_blk = d_lane_pad // num_lane_blocks
    d_contract_pad = _round_up(d_sp, tk)
    num_k = d_contract_pad // tk
    x_cols = max(d_contract_pad, d_lane_pad)       # x serves both roles

    xp = _pad2(x, n_pad, x_cols)
    wkp = _pad2(wk, d_contract_pad, dk_pad)
    wvp = _pad2(wv, d_contract_pad, d_lane_pad)

    kernel = functools.partial(_refinement_kernel, tk=tk, lane_blk=lane_blk,
                               d_k=d_k, n_true=n)
    out = pl.pallas_call(
        kernel,
        out_shape=jax.ShapeDtypeStruct((n_pad, d_lane_pad), x.dtype),
        grid_spec=pltpu.PrefetchScalarGridSpec(
            num_scalar_prefetch=0,
            grid=(num_lane_blocks, num_k),
            in_specs=[
                pl.BlockSpec((n_pad, x_cols), lambda j, k: (0, 0)),   # x (resident)
                pl.BlockSpec((tk, dk_pad), lambda j, k: (k, 0)),      # wk tile
                pl.BlockSpec((tk, lane_blk), lambda j, k: (k, j)),    # wv tile
            ],
            out_specs=pl.BlockSpec((n_pad, lane_blk), lambda j, k: (0, j)),
            scratch_shapes=[
                pltpu.VMEM((n_pad, dk_pad), jnp.float32),     # key/query acc
                pltpu.VMEM((n_pad, lane_blk), jnp.float32),   # value acc
            ],
        ),
        compiler_params=pltpu.CompilerParams(
            dimension_semantics=("parallel", "arbitrary"),
            vmem_limit_bytes=vmem_limit_bytes,
        ),
    )(xp, wkp, wvp)

    # LayerNorm(x + attn) over the true feature dim as a trivial follow-up op
    # on the [N, D_sp] result (negligible bandwidth vs the wv stream).
    y = out[:n, :d_sp]
    mu = jnp.mean(y, axis=-1, keepdims=True)
    var = jnp.mean(jnp.square(y - mu), axis=-1, keepdims=True)
    return (y - mu) * jax.lax.rsqrt(var + eps) * gamma + beta


def sp_module_forward(x, params, *, tk=None, num_lane_blocks=None):
    """SPModule.forward: two chained refinement calls (returns X_2)."""
    wk, wv, gamma, beta = params
    x1 = refinement(x, wk, wv, gamma, beta, tk=tk,
                    num_lane_blocks=num_lane_blocks)
    x2 = refinement(x1, wk, wv, gamma, beta, tk=tk,
                    num_lane_blocks=num_lane_blocks)
    return x2


def init_params(key, d_sp, d_k):
    k1, k2 = jax.random.split(key)
    bound = 1.0 / math.sqrt(d_sp)
    # nn.Linear-style init; stored transposed for x @ W and in bf16 (bandwidth).
    wk = jax.random.uniform(k1, (d_sp, d_k), jnp.float32,
                            -bound, bound).astype(jnp.bfloat16)
    wv = jax.random.uniform(k2, (d_sp, d_sp), jnp.float32,
                            -bound, bound).astype(jnp.bfloat16)
    gamma = jnp.ones((1, d_sp), jnp.float32)   # LayerNorm.weight init
    beta = jnp.zeros((1, d_sp), jnp.float32)   # LayerNorm.bias init
    return wk, wv, gamma, beta


def _reference(x, params, eps=1e-5):
    """Pure-JAX reference mirroring the kernel numerics: bf16 weights and
    bf16-cast activations at the matmul inputs, f32 everywhere else."""
    wk, wv, gamma, beta = params

    def refine(h):
        hb = h.astype(jnp.bfloat16)
        k = jnp.dot(hb, wk, preferred_element_type=jnp.float32)
        v = jnp.dot(hb, wv, preferred_element_type=jnp.float32)
        s = (k @ k.T) / math.sqrt(wk.shape[1])
        p = jax.nn.softmax(s, axis=1)
        w = jnp.maximum(p @ v, 0.0)
        y = h + w
        mu = y.mean(-1, keepdims=True)
        var = ((y - mu) ** 2).mean(-1, keepdims=True)
        return (y - mu) * jax.lax.rsqrt(var + eps) * gamma + beta

    return refine(refine(x))


if __name__ == "__main__":
    N, D_SP, D_K = 8, 256, 128   # small stand-ins for (N, 7756, 1024)

    key = jax.random.PRNGKey(0)
    kx, kp = jax.random.split(key)
    x = jax.random.normal(kx, (N, D_SP), jnp.float32)
    params = init_params(kp, D_SP, D_K)
    ref = _reference(x, params)

    # tk=128 -> 2-step contraction grid (exercises accumulation); check both
    # the single-lane-block path (v5e/v6e) and the 2-way lane split (v7x TCs).
    for num_j in (1, 2):
        fwd = jax.jit(functools.partial(sp_module_forward, tk=128,
                                        num_lane_blocks=num_j))
        out = jax.block_until_ready(fwd(x, params))
        assert out.shape == (N, D_SP)
        max_err = float(jnp.max(jnp.abs(out - ref)))
        # bf16 activations + approx softmax reciprocal over two chained
        # refinements -> allow a few e-3 of drift vs the mirrored reference.
        assert max_err < 2e-2, \
            f"num_lane_blocks={num_j}: mismatch vs reference (max abs err {max_err})"
    print("KERNEL_OK")
</pallas_src>

<mosaic_0001>
module attributes {stable_mosaic.version = 11 : i64} {
  func.func @_refinement_kernel(%arg0: i32, %arg1: i32, %arg2: memref<8x256xf32, #tpu.memory_space<vmem>>, %arg3: memref<128x128xbf16, #tpu.memory_space<vmem>>, %arg4: memref<128x256xbf16, #tpu.memory_space<vmem>>, %arg5: memref<8x256xf32, #tpu.memory_space<vmem>>, %arg6: memref<8x128xf32, #tpu.memory_space<vmem>>, %arg7: memref<8x256xf32, #tpu.memory_space<vmem>>) attributes {dimension_semantics = [#tpu.dimension_semantics<parallel>, #tpu.dimension_semantics<arbitrary>], iteration_bounds = array<i64: 1, 2>, scalar_prefetch = 0 : i64, scratch_operands = 2 : i64, tpu.core_type = #tpu.core_type<tc>, window_params = [{pipeline_mode = #tpu.pipeline_mode<synchronous>, transform_indices = @transform_0, window_bounds = array<i64: 8, 256>}, {transform_indices = @transform_1, window_bounds = array<i64: 128, 128>}, {transform_indices = @transform_2, window_bounds = array<i64: 128, 256>}, {transform_indices = @transform_3, window_bounds = array<i64: 8, 256>}]} {
    %c0_i32 = arith.constant 0 : i32
    %0 = arith.cmpi eq, %arg1, %c0_i32 : i32
    %1 = arith.extui %0 : i1 to i32
    %c0_i32_0 = arith.constant 0 : i32
    %2 = arith.cmpi ne, %1, %c0_i32_0 : i32
    scf.if %2 {
      %cst_15 = arith.constant 0.000000e+00 : f32
      %21 = vector.broadcast %cst_15 : f32 to vector<8x128xf32>
      %c0_16 = arith.constant 0 : index
      %c0_17 = arith.constant 0 : index
      %22 = vector.load %arg6[%c0_16, %c0_17] : memref<8x128xf32, #tpu.memory_space<vmem>>, vector<8x128xf32>
      tpu.vector_store %arg6[%c0_16, %c0_17], %21 {strides = array<i32>} : memref<8x128xf32, #tpu.memory_space<vmem>>, vector<8x128xf32>,
      %cst_18 = arith.constant 0.000000e+00 : f32
      %23 = vector.broadcast %cst_18 : f32 to vector<8x256xf32>
      %c0_19 = arith.constant 0 : index
      %c0_20 = arith.constant 0 : index
      %24 = vector.load %arg7[%c0_19, %c0_20] : memref<8x256xf32, #tpu.memory_space<vmem>>, vector<8x256xf32>
      tpu.vector_store %arg7[%c0_19, %c0_20], %23 {strides = array<i32>} : memref<8x256xf32, #tpu.memory_space<vmem>>, vector<8x256xf32>,
    } else {
    }
    %c128_i32 = arith.constant 128 : i32
    %3 = arith.muli %arg1, %c128_i32 : i32
    %4 = tpu.assume_multiple %3, 128 : i32
    %c0 = arith.constant 0 : index
    %5 = arith.index_cast %4 : i32 to index
    %6 = vector.load %arg2[%c0, %5] : memref<8x256xf32, #tpu.memory_space<vmem>>, vector<8x128xf32>
    %7 = arith.truncf %6 : vector<8x128xf32> to vector<8x128xbf16>
    %c0_1 = arith.constant 0 : index
    %c0_2 = arith.constant 0 : index
    %8 = vector.load %arg6[%c0_1, %c0_2] : memref<8x128xf32, #tpu.memory_space<vmem>>, vector<8x128xf32>
    %c0_3 = arith.constant 0 : index
    %c0_4 = arith.constant 0 : index
    %9 = vector.load %arg3[%c0_3, %c0_4] : memref<128x128xbf16, #tpu.memory_space<vmem>>, vector<128x128xbf16>
    %cst = arith.constant dense<0.000000e+00> : vector<8x128xf32>
    %10 = tpu.matmul %7, %9, %cst {dimension_numbers = #tpu.dot_dimension_numbers<[1], [0], [0], [1], [0, 0, 1, 1], [], []>} : vector<8x128xbf16>, vector<128x128xbf16>, vector<8x128xf32> -> vector<8x128xf32>
    %11 = arith.addf %8, %10 : vector<8x128xf32>
    %c0_5 = arith.constant 0 : index
    %c0_6 = arith.constant 0 : index
    %12 = vector.load %arg6[%c0_5, %c0_6] : memref<8x128xf32, #tpu.memory_space<vmem>>, vector<8x128xf32>
    tpu.vector_store %arg6[%c0_5, %c0_6], %11 {strides = array<i32>} : memref<8x128xf32, #tpu.memory_space<vmem>>, vector<8x128xf32>,
    %c0_7 = arith.constant 0 : index
    %c0_8 = arith.constant 0 : index
    %13 = vector.load %arg7[%c0_7, %c0_8] : memref<8x256xf32, #tpu.memory_space<vmem>>, vector<8x256xf32>
    %c0_9 = arith.constant 0 : index
    %c0_10 = arith.constant 0 : index
    %14 = vector.load %arg4[%c0_9, %c0_10] : memref<128x256xbf16, #tpu.memory_space<vmem>>, vector<128x256xbf16>
    %cst_11 = arith.constant dense<0.000000e+00> : vector<8x256xf32>
    %15 = tpu.matmul %7, %14, %cst_11 {dimension_numbers = #tpu.dot_dimension_numbers<[1], [0], [0], [1], [0, 0, 1, 1], [], []>} : vector<8x128xbf16>, vector<128x256xbf16>, vector<8x256xf32> -> vector<8x256xf32>
    %16 = arith.addf %13, %15 : vector<8x256xf32>
    %c0_12 = arith.constant 0 : index
    %c0_13 = arith.constant 0 : index
    %17 = vector.load %arg7[%c0_12, %c0_13] : memref<8x256xf32, #tpu.memory_space<vmem>>, vector<8x256xf32>
    tpu.vector_store %arg7[%c0_12, %c0_13], %16 {strides = array<i32>} : memref<8x256xf32, #tpu.memory_space<vmem>>, vector<8x256xf32>,
    %c1_i32 = arith.constant 1 : i32
    %18 = arith.cmpi eq, %arg1, %c1_i32 : i32
    %19 = arith.extui %18 : i1 to i32
    %c0_i32_14 = arith.constant 0 : i32
    %20 = arith.cmpi ne, %19, %c0_i32_14 : i32
    scf.if %20 {
      %c0_15 = arith.constant 0 : index
      %c0_16 = arith.constant 0 : index
      %21 = vector.load %arg6[%c0_15, %c0_16] : memref<8x128xf32, #tpu.memory_space<vmem>>, vector<8x128xf32>
      %cst_17 = arith.constant dense<0.000000e+00> : vector<8x8xf32>
      %22 = tpu.matmul %21, %21, %cst_17 {dimension_numbers = #tpu.dot_dimension_numbers<[1], [1], [0], [0], [0, 0, 1, 0], [], []>} : vector<8x128xf32>, vector<8x128xf32>, vector<8x8xf32> -> vector<8x8xf32>
      %cst_18 = arith.constant 0.0883883461 : f32
      %23 = vector.broadcast %cst_18 : f32 to vector<8x8xf32>
      %24 = arith.mulf %22, %23 : vector<8x8xf32>
      %cst_19 = arith.constant dense<0xFF800000> : vector<8xf32>
      %25 = vector.multi_reduction <maximumf>, %24, %cst_19 [1] : vector<8x8xf32> to vector<8xf32>
      %26 = vector.shape_cast %25 : vector<8xf32> to vector<8x1xf32>
      %27 = vector.broadcast %26 : vector<8x1xf32> to vector<8x8xf32>
      %28 = arith.subf %24, %27 : vector<8x8xf32>
      %29 = math.exp %28 : vector<8x8xf32>
      %cst_20 = arith.constant dense<0.000000e+00> : vector<8xf32>
      %30 = vector.multi_reduction <add>, %29, %cst_20 [1] : vector<8x8xf32> to vector<8xf32>
      %31 = vector.shape_cast %30 : vector<8xf32> to vector<8x1xf32>
      %32 = tpu.reciprocal %31 {approx = true} : vector<8x1xf32> -> vector<8x1xf32>
      %33 = vector.broadcast %32 : vector<8x1xf32> to vector<8x8xf32>
      %34 = arith.mulf %29, %33 : vector<8x8xf32>
      %c0_21 = arith.constant 0 : index
      %c0_22 = arith.constant 0 : index
      %35 = vector.load %arg7[%c0_21, %c0_22] : memref<8x256xf32, #tpu.memory_space<vmem>>, vector<8x256xf32>
      %cst_23 = arith.constant dense<0.000000e+00> : vector<8x256xf32>
      %36 = tpu.matmul %34, %35, %cst_23 {dimension_numbers = #tpu.dot_dimension_numbers<[1], [0], [0], [1], [0, 0, 1, 1], [], []>} : vector<8x8xf32>, vector<8x256xf32>, vector<8x256xf32> -> vector<8x256xf32>
      %cst_24 = arith.constant 0.000000e+00 : f32
      %37 = vector.broadcast %cst_24 : f32 to vector<8x256xf32>
      %38 = arith.maximumf %36, %37 : vector<8x256xf32>
      %c256_i32 = arith.constant 256 : i32
      %39 = arith.muli %arg0, %c256_i32 : i32
      %40 = tpu.assume_multiple %39, 128 : i32
      %c0_25 = arith.constant 0 : index
      %41 = arith.index_cast %40 : i32 to index
      %42 = vector.load %arg2[%c0_25, %41] : memref<8x256xf32, #tpu.memory_space<vmem>>, vector<8x256xf32>
      %43 = arith.addf %42, %38 : vector<8x256xf32>
      %c0_26 = arith.constant 0 : index
      %c0_27 = arith.constant 0 : index
      %44 = vector.load %arg5[%c0_26, %c0_27] : memref<8x256xf32, #tpu.memory_space<vmem>>, vector<8x256xf32>
      tpu.vector_store %arg5[%c0_26, %c0_27], %43 {strides = array<i32>} : memref<8x256xf32, #tpu.memory_space<vmem>>, vector<8x256xf32>,
    } else {
    }
    return
  }
  func.func @transform_0(%arg0: i32, %arg1: i32) -> (i32, i32) {
    %c0_i32 = arith.constant 0 : i32
    %c0_i32_0 = arith.constant 0 : i32
    %c0_i32_1 = arith.constant 0 : i32
    return %c0_i32, %c0_i32_0 : i32, i32
  }
  func.func @transform_1(%arg0: i32, %arg1: i32) -> (i32, i32) {
    %c0_i32 = arith.constant 0 : i32
    %c0_i32_0 = arith.constant 0 : i32
    return %arg1, %c0_i32 : i32, i32
  }
  func.func @transform_2(%arg0: i32, %arg1: i32) -> (i32, i32) {
    %c0_i32 = arith.constant 0 : i32
    return %arg1, %arg0 : i32, i32
  }
  func.func @transform_3(%arg0: i32, %arg1: i32) -> (i32, i32) {
    %c0_i32 = arith.constant 0 : i32
    %c0_i32_0 = arith.constant 0 : i32
    return %c0_i32, %arg0 : i32, i32
  }
}

</mosaic_0001>

<bundles_post_ra>
// kernel: sp_module_forward.2
= control target key start
LH: loop header
LB: loop body
LE: loop exit
PB: predicated region body
PF: predicated region fallthrough
CT: control target
= control target key end

     0   :  { %8 = vsyncpa [#allocation5], 0  ;;  %s1480_s0 = inlined_call_operand.hbm [shape: f32[8,256], index: 0, kind: input, shape index: {}]   ;;  %s1481_s1 = inlined_call_operand.hbm [shape: bf16[256,128], index: 1, kind: input, shape index: {}]   ;;  %s1482_s2 = inlined_call_operand.hbm [shape: bf16[256,256], index: 2, kind: input, shape index: {}]   ;;  %s1483_s3 = inlined_call_operand.hbm [shape: f32[8,256], index: 3, kind: output, shape index: {}]  }
   0x1   :  { %9 = vsyncpa [#allocation8], 0 }
   0x2   :  { %11 = vsyncpa [#allocation8 + $0x1], 0 }
   0x3   :  { %12 = vsyncpa [#allocation6], 0  ;;  %s1224_s12 = smov 0   ;;  %s1226_s13 = smov 0  }
   0x4   :  { %s1228_s14 = smov 0   ;;  %s1230_s15 = smov 0  }
   0x5   :  { %s1232_s16 = smov 0   ;;  %s1234_s17 = smov 0  }
   0x6 LB: > { %s27_s18 = sadd.s32 1, %s1184_s16  ;;  %s58_s19 = sadd.s32 1, %s1176_s14  ;;  %s1188_s17 = sphi %s1234_s17, %s18_s17   ;;  %s1184_s16 = sphi %s1232_s16, %s1499_s16   ;;  %s1180_s15 = sphi %s1230_s15, %s1498_s15   ;;  %s1176_s14 = sphi %s1228_s14, %s1497_s14   ;;  %s1172_s13 = sphi %s1226_s13, %s1496_s13   ;;  %s1168_s12 = sphi %s1224_s12, %s1495_s12  }
   0x7   : > { %p28_p0 = scmp.ge.s32.totalorder %s27_s18, 2  ;;  %p65_p1 = scmp.ne.s32.totalorder %s1176_s14, %s1172_s13 }
   0x8   : > { %p66_p2 = scmp.eq.s32.totalorder %s1188_s17, 0  ;;  %p916_p4 = scmp.lt.s32.totalorder %s1188_s17, 2 }
   0x9   : > { %s1501_s18 = smov (%p28_p0, %s27_s18), 0  ;;  %s160_s21 = sand.u32 1, %s1188_s17  }
   0xa   : > { %p67_p3 = por %p66_p2, %p65_p1  ;;  %s55_s20 = ssub.s32 %s1184_s16, %s1501_s18 }
   0xb   : > { %p56_p5 = scmp.eq.s32.totalorder %s55_s20, 0  ;;  %s162_s22 = sand.u32 1, %s1176_s14  }
   0xc   : > { %s853_s23 = sshll.u32 %s1184_s16, 10  ;;  %s809_s25 = sshll.u32 %s162_s22, 6 }
   0xd   : > { %s1268_s24 = scalar_select %p56_p5, %s1176_s14, %s58_s19  }
   0xe   : > { %s1273_s28 = scalar_lea.hbm %s1481_s1, %s853_s23  ;;  %p1275_p6 = pnand %p916_p4, %p67_p3 }
   0xf   : > { %s164_s30 = scalar_lea.vmem [#allocation7], %s809_s25  ;;  %s1281_s5 = sshll.u32 %s162_s22, 7 }
  0x10   : > { %s171_s4 = sshll.u32 %s164_s30, 4  ;;  %s1283_s6 = scalar_lea.sflag [#allocation8], %s160_s21  ;;  %s1279_s4 = int_to_ptr.vmem [resolvable:$true] %s171_s4 }
  0x11   : > { %s1016_s7 = scalar_lea.hbm %s1273_s28, 1024  ;;  %p1018_p8 = pneg %p1275_p6 }
  0x12   : > { %p1017_p7 = scmp.ne.s32.totalorder %s1273_s28, %s1016_s7  ;;  %s1021_s10 = scalar_lea.hbm %s1481_s1, 2048 }
  0x13   : > { %p1022_p11 = scmp.lt.u32.totalorder %s1273_s28, %s1481_s1  ;;  %p1023_p12 = scmp.lt.u32.totalorder %s1021_s10, %s1016_s7 }
  0x14   : > { %p1019_p9 = pnand %p1018_p8, %p1017_p7  ;;  %p1025_p0 = scmp.lt.u32.totalorder %s1016_s7, %s1273_s28 }
  0x15   : > { %p1024_p13 = por %p1023_p12, %p1022_p11 }
  0x16   : > { %p1020_p10 = pneg %p1019_p9 }
  0x17   : > { %p1026_p1 = por %p1025_p0, %p1024_p13 }
  0x19   : > { %p1027_p2 = pnand %p1026_p1, %p1020_p10 }
  0x1b   : > { %1030 = shalt.err (!%p1027_p2)
}
  0x1c   : > { %s1031_s20 = scalar_lea.vmem %s1279_s4, 1024  ;;  %s1190_s21 = smov [#allocation7]  }
  0x1d   : > { %p1032_p3 = scmp.ne.s32.totalorder %s1279_s4, %s1031_s20  ;;  %s1036_s22 = sshll.u32 %s1190_s21, 4  ;;  %s1037_s22 = int_to_ptr.vmem [resolvable:$false] %s1036_s22 }
  0x1e   : > { %s1038_s23 = scalar_lea.vmem %s1037_s22, 2048  ;;  %p1039_p7 = scmp.lt.s32.totalorder %s1279_s4, %s1037_s22 }
  0x1f   : > { %p1034_p4 = pnand %p1032_p3, %p1018_p8  ;;  %p1040_p9 = scmp.lt.s32.totalorder %s1038_s23, %s1031_s20 }
  0x21   : > { %p1035_p5 = pneg %p1034_p4  ;;  %p1041_p11 = por %p1040_p9, %p1039_p7 }
  0x23   : > { %p1042_p12 = pnand %p1041_p11, %p1035_p5 }
  0x25   : > { %1045 = shalt.err (!%p1042_p12)
}
  0x26   : > { %s1191_s25 = smov 64   ;;  %s1192_s26 = smov 4  }
  0x27   : > { %911 = dma.hbm_to_vmem [thread:$0]  (!%p1275_p6), %s1273_s28, 1024, %s1279_s4, %s1283_s6, %s1191_s25, %s1191_s25, %s1192_s26  }
  0x28   : > { %s185_s27 = scalar_lea.vmem [#allocation9], %s1281_s5  ;;  %s1313_s7 = sadd.s32 4294967295, %s1188_s17  }
  0x29   : > { %s195_s30 = sshll.u32 %s185_s27, 4  ;;  %p71_p10 = scmp.ne.s32.totalorder %s1172_s13, %s1168_s12  ;;  %s1340_s30 = int_to_ptr.vmem [resolvable:$true] %s195_s30 }
  0x2a   : > { %p1484_p13 = scmp.eq.s32.totalorder %s1313_s7, 0  ;;  %p806_p0 = scmp.ge.s32.totalorder %s1188_s17, 1 }
  0x2b   : > { %p136_p1 = scmp.lt.s32.totalorder %s1188_s17, 3  ;;  %s1193_s28 = smov [#allocation4]  }
  0x2c   : > { %p1322_p2 = por %p1484_p13, %p71_p10  ;;  %s149_s4 = sshll.u32 %s1193_s28, 4  ;;  %s1330_s4 = int_to_ptr.vmem [resolvable:$true] %s149_s4 }
  0x2d   : > { %p1326_p3 = pnand %p806_p0, %p136_p1  ;;  %s855_s5 = sshll.u32 %s1184_s16, 11 }
  0x2e   : > { %s1488_s8 = scalar_select %p1322_p2, 1, 0 }
  0x2f   : > { %s1489_s9 = scalar_select %p1326_p3, 1, 0 }
  0x30   : > { %p904_p4 = pneg %p1326_p3  ;;  %s1338_s11 = scalar_lea.hbm %s1482_s2, %s855_s5 }
  0x31   : > { %s1046_s20 = scalar_lea.hbm %s1338_s11, 2048  ;;  %s1051_s23 = scalar_lea.hbm %s1482_s2, 4096 }
  0x32   : > { %p1344_p5 = pnand %p904_p4, %p1484_p13  ;;  %p1047_p7 = scmp.ne.s32.totalorder %s1338_s11, %s1046_s20 }
  0x33   : > { %p1052_p12 = scmp.lt.u32.totalorder %s1338_s11, %s1482_s2  ;;  %p1053_p10 = scmp.lt.u32.totalorder %s1051_s23, %s1046_s20 }
  0x34   : > { %p1049_p9 = pnand %p1047_p7, %p1018_p8  ;;  %p1055_p1 = scmp.lt.u32.totalorder %s1046_s20, %s1338_s11 }
  0x35   : > { %p1054_p0 = por %p1053_p10, %p1052_p12 }
  0x36   : > { %p1050_p11 = pneg %p1049_p9 }
  0x37   : > { %p1056_p4 = por %p1055_p1, %p1054_p0 }
  0x39   : > { %p1057_p13 = pnand %p1056_p4, %p1050_p11 }
  0x3b   : > { %1060 = shalt.err (!%p1057_p13)
}
  0x3c   : > { %s1061_s27 = scalar_lea.vmem %s1340_s30, 2048  ;;  %s1194_s28 = smov [#allocation9]  }
  0x3d   : > { %p1062_p7 = scmp.ne.s32.totalorder %s1340_s30, %s1061_s27  ;;  %s1066_s5 = sshll.u32 %s1194_s28, 4  ;;  %s1067_s5 = int_to_ptr.vmem [resolvable:$false] %s1066_s5 }
  0x3e   : > { %s1068_s12 = scalar_lea.vmem %s1067_s5, 4096  ;;  %p1069_p3 = scmp.lt.s32.totalorder %s1340_s30, %s1067_s5 }
  0x3f   : > { %p1064_p9 = pnand %p1062_p7, %p1018_p8  ;;  %p1070_p12 = scmp.lt.s32.totalorder %s1068_s12, %s1061_s27 }
  0x41   : > { %p1065_p2 = pneg %p1064_p9  ;;  %p1071_p10 = por %p1070_p12, %p1069_p3 }
  0x43   : > { %p1072_p0 = pnand %p1071_p10, %p1065_p2 }
  0x45   : > { %1075 = shalt.err (!%p1072_p0)
}
  0x46   : > { %s1195_s10 = smov 128   ;;  %s1196_s20 = smov 8  }
  0x47   : > { %914 = dma.hbm_to_vmem [thread:$0]  (!%p1275_p6), %s1338_s11, 2048, %s1340_s30, %s1283_s6, %s1195_s10, %s1195_s10, %s1196_s20  }
  0x48   : > { %s1076_s23 = scalar_lea.hbm %s1480_s0, 256  ;;  %p1078_p13 = pneg %p1344_p5 }
  0x49   : > { %p1077_p8 = scmp.ne.s32.totalorder %s1480_s0, %s1076_s23  ;;  %p1083_p11 = scmp.lt.u32.totalorder %s1076_s23, %s1480_s0 }
  0x4b   : > { %p1079_p2 = pnand %p1078_p13, %p1077_p8 }
  0x4d   : > { %p1080_p3 = pneg %p1079_p2 }
  0x4f   : > { %p1085_p1 = pnand %p1083_p11, %p1080_p3 }
  0x51   : > { %1088 = shalt.err (!%p1085_p1)
}
  0x52   : > { %s1089_s29 = scalar_lea.vmem %s1330_s4, 256  ;;  %p1097_p9 = scmp.lt.s32.totalorder %s1330_s4, %s1330_s4 }
  0x53   : > { %p1090_p6 = scmp.ne.s32.totalorder %s1330_s4, %s1089_s29  ;;  %p1098_p12 = scmp.lt.s32.totalorder %s1089_s29, %s1089_s29 }
  0x55   : > { %p1092_p4 = pnand %p1090_p6, %p1078_p13  ;;  %p1099_p10 = por %p1098_p12, %p1097_p9 }
  0x57   : > { %p1093_p7 = pneg %p1092_p4 }
  0x59   : > { %p1100_p0 = pnand %p1099_p10, %p1093_p7 }
  0x5b   : > { %1103 = shalt.err (!%p1100_p0)
}
  0x5c   : > { %907 = dma.hbm_to_vmem [thread:$0]  (!%p1344_p5), %s1480_s0, 256, %s1330_s4, [#allocation5]  }
  0x5d   : > { %p1491_p8 = scmp.ne.s32.totalorder %s1489_s9, 0 }
  0x5e   : > { %p1492_p2 = scmp.eq.s32.totalorder (!%p1491_p8), %s1313_s7, 0 }
  0x5f   : > { %207 = sbr.rel (%p1491_p8) target bundleno = 1146 (0x47a), region = 32 }
  0x66   : > { %1155 = dma.done.wait (%p1492_p2), [#allocation5], 256   ;;  %p1493_p13 = pmov %p1492_p2 }
  0x67   : > { %s213_s11 = sand.u32 1, %s1313_s7   ;;  %s215_s5 = sand.u32 1, %s1172_s13  }
  0x68   : > { %1157 = vsyncadd (%p1493_p13), [#allocation5], 4294967040  ;;  %s818_s19 = sshll.u32 %s215_s5, 6  ;;  %s214_s12 = scalar_lea.sflag [#allocation8], %s213_s11 }
  0x69   : > { %s1401_s10 = scalar_lea.vmem [#allocation7], %s818_s19  ;;  %p1494_p3 = scmp.ne.s32.totalorder %s1488_s8, 0 }
  0x6b   : > { %1159 = dma.done.wait (%p1494_p3), %s214_s12, 3072  }
  0x6c   : > { %1161 = vsyncadd (%p1494_p3), %s214_s12, 4294964224  ;;  %s819_s9 = sshll.u32 %s215_s5, 7  ;;  %p820_p5 = scmp.ne.s32.totalorder %s1180_s15, 0 }
  0x6d   : > { %s1407_s4 = scalar_lea.vmem [#allocation9], %s819_s9  ;;  %v1197_v0 = vmov (!%p820_p5), 0.0  }
  0x6e   : > { %257 = sbr.rel (%p820_p5) target bundleno = 117 (0x75), region = 48  ;;  %258 = vst [vmem:[#allocation2] sm:$0xff] (!%p820_p5), %v1197_v0  ;;  %259 = vst [vmem:[#allocation3] sm:$0xff] (!%p820_p5), %v1197_v0 }
  0x6f   : > { %260 = vst [vmem:[#allocation3 + $0x8] sm:$0xff] (!%p820_p5), %v1197_v0 }
  0x75 PF: > { %v980_v1 = vld [vmem:[%s1401_s10] sm:$0xff]   ;;  %v1198_v2 = vmov 0.0   ;;  %vm1199_vm0 = vmmov 0   ;;  %v984_v5 = vld [vmem:[%s1401_s10 + $0x8] sm:$0xff]   ;;  %v985_v6 = vld [vmem:[%s1407_s4 + $0x14] ss:$8 sps:$4 sm:$0xff]  }
  0x76   : > { %867 = vmatprep.subr.bf16.mxu0 %v1198_v2  ;;  %v981_v3 = vld [vmem:[%s1407_s4 + $0x4] ss:$8 sps:$4 sm:$0xff]   ;;  %v983_v4 = vld [vmem:[%s1407_s4] ss:$8 sps:$4 sm:$0xff]   ;;  %883 = vmatprep.mubr.msk.bf16.mxu0 %vm1199_vm0, %v1198_v2  ;;  %v987_v7 = vld [vmem:[%s1407_s4 + $0x10] ss:$8 sps:$4 sm:$0xff]  }
  0x77   : > { %868 = vmatpush3.bf16.msra.mxu0 %v980_v1  ;;  %473 = vmatprep.subr.bf16.mxu1 %v981_v3  ;;  %v1200_v8 = vmov 0   ;;  %v988_v9 = vld [vmem:[%s1401_s10 + $0x10] sm:$0xff]   ;;  %v989_v10 = vld [vmem:[%s1407_s4 + $0x24] ss:$8 sps:$4 sm:$0xff]   ;;  %v991_v11 = vld [vmem:[%s1407_s4 + $0x20] ss:$8 sps:$4 sm:$0xff]  }
  0x78   : > { %869 = vmatprep.subr.bf16.mxu0 %v1198_v2  ;;  %474 = vmatpush1.bf16.msra.mxu1 %v983_v4  ;;  %v993_v12 = vld [vmem:[%s1407_s4 + $0x34] ss:$8 sps:$4 sm:$0xff]   ;;  %v995_v14 = vld [vmem:[%s1407_s4 + $0x30] ss:$8 sps:$4 sm:$0xff]   ;;  %v997_v15 = vld [vmem:[%s1407_s4 + $0x44] ss:$8 sps:$4 sm:$0xff]  }
  0x79   : > { %505 = vmatprep.mubr.bf16.mxu1 %v1200_v8  ;;  %475 = vmatprep.subr.bf16.mxu1 %v985_v6  ;;  %v992_v13 = vld [vmem:[%s1401_s10 + $0x18] sm:$0xff]   ;;  %v996_v16 = vld [vmem:[%s1401_s10 + $0x20] sm:$0xff]   ;;  %s821_s8 = sshll.u32 %s1180_s15, 7  ;;  %v1000_v19 = vld [vmem:[%s1401_s10 + $0x28] sm:$0xff]   ;;  %p847_p11 = scmp.ne.s32.totalorder %s1180_s15, 1 }
  0x7a   : > { %v999_v17 = vld [vmem:[%s1407_s4 + $0x40] ss:$8 sps:$4 sm:$0xff]   ;;  %v1001_v18 = vld [vmem:[%s1407_s4 + $0x54] ss:$8 sps:$4 sm:$0xff]   ;;  %s262_s20 = sshra.s32 %s821_s8, 7  ;;  %v1201_v44 = vmov (!%p847_p11), 0.0  }
  0x7b   : > { %870 = vmatpush3.bf16.msra.mxu0 %v984_v5  ;;  %v1003_v20 = vld [vmem:[%s1407_s4 + $0x50] ss:$8 sps:$4 sm:$0xff]   ;;  %s822_s21 = sshll.u32 %s262_s20, 3  ;;  %v1005_v21 = vld [vmem:[%s1407_s4 + $0x64] ss:$8 sps:$4 sm:$0xff]   ;;  %vm1202_vm1 = vmmov (!%p847_p11), 0  }
  0x7c   : > { %871 = vmatprep.subr.bf16.mxu0 %v1198_v2  ;;  %476 = vmatpush1.bf16.msra.mxu1 %v987_v7  ;;  %v1004_v22 = vld [vmem:[%s1401_s10 + $0x30] sm:$0xff]   ;;  %v1007_v23 = vld [vmem:[%s1407_s4 + $0x60] ss:$8 sps:$4 sm:$0xff]   ;;  %v1008_v25 = vld [vmem:[%s1401_s10 + $0x38] sm:$0xff]   ;;  %s265_s22 = scalar_lea.vmem [#allocation4], %s822_s21  ;;  %vm594_vm2 = vcmask (!%p847_p11), 64512  }
  0x7d   : > { %477 = vmatprep.subr.bf16.mxu1 %v989_v10  ;;  %v1009_v24 = vld [vmem:[%s1407_s4 + $0x74] ss:$8 sps:$4 sm:$0xff]   ;;  %v1011_v27 = vld [vmem:[%s1407_s4 + $0x70] ss:$8 sps:$4 sm:$0xff]   ;;  %v375_v31 = vld [vmem:[#allocation3] sm:$0xff] }
  0x7e   : > { %v266_v26 = vld [vmem:[%s265_s22] sm:$0xff]  ;;  %v376_v34 = vld [vmem:[#allocation3 + $0x8] sm:$0xff]  ;;  %v689_v60 = vld [vmem:[#allocation4] sm:$0xff] (!%p847_p11) }
  0x7f   : > { %872 = vmatpush3.bf16.msra.mxu0 %v988_v9  ;;  %v267_v28 = vpack.c.bf16 %v266_v26, %v266_v26  ;;  %v268_v29 = vld [vmem:[#allocation2] sm:$0xff] }
  0x80   : > { %873 = vmatprep.subr.bf16.mxu0 %v1198_v2  ;;  %478 = vmatpush1.bf16.msra.mxu1 %v991_v11  ;;  %v690_v63 = vld [vmem:[#allocation4 + $0x8] sm:$0xff] (!%p847_p11) }
  0x81   : > { %479 = vmatprep.subr.bf16.mxu1 %v993_v12 }
  0x83   : > { %874 = vmatpush3.bf16.msra.mxu0 %v992_v13 }
  0x84   : > { %875 = vmatprep.subr.bf16.mxu0 %v1198_v2  ;;  %480 = vmatpush1.bf16.msra.mxu1 %v995_v14 }
  0x85   : > { %481 = vmatprep.subr.bf16.mxu1 %v997_v15 }
  0x87   : > { %876 = vmatpush3.bf16.msra.mxu0 %v996_v16 }
  0x88   : > { %877 = vmatprep.subr.bf16.mxu0 %v1198_v2  ;;  %482 = vmatpush1.bf16.msra.mxu1 %v999_v17 }
  0x89   : > { %483 = vmatprep.subr.bf16.mxu1 %v1001_v18 }
  0x8b   : > { %878 = vmatpush3.bf16.msra.mxu0 %v1000_v19 }
  0x8c   : > { %879 = vmatprep.subr.bf16.mxu0 %v1198_v2  ;;  %484 = vmatpush1.bf16.msra.mxu1 %v1003_v20 }
  0x8d   : > { %485 = vmatprep.subr.bf16.mxu1 %v1005_v21 }
  0x8f   : > { %880 = vmatpush3.bf16.msra.mxu0 %v1004_v22 }
  0x90   : > { %881 = vmatprep.subr.bf16.mxu0 %v1198_v2  ;;  %486 = vmatpush1.bf16.msra.mxu1 %v1007_v23 }
  0x91   : > { %487 = vmatprep.subr.bf16.mxu1 %v1009_v24 }
  0x93   : > { %882 = vmatpush3.bf16.msra.mxu0 %v1008_v25 }
  0x94   : > { %488 = vmatpush1.bf16.msra.mxu1 %v1011_v27  ;;  %887 = vmatprep.subr.mxu0 (!%p847_p11), %v1201_v44 }
  0x96   : > { %884 = vmatmul.mubr.bf16.vlgmr.msra.gmra.mrb[0].mxu0 %v267_v28 }
  0x97   : > { %506 = vmatmul.mubr.bf16.vlgmr.msra.gmra.mrb[0].mxu1 %v267_v28  ;;  %889 = vmatprep.mubr.msk.f32.mxu0 (!%p847_p11), %vm1202_vm1, %v1201_v44 }
  0x98   : > { %675 = vmatprep.mubr.f32.mxu1 (!%p847_p11), %v1201_v44 }
 0x168   : > { %521 = sbr.rel (%p847_p11) target bundleno = 1121 (0x461), region = 52 }
 0x169   : > { %v367_v30 = vpop.f32.mrb[0].mxu0 }
 0x16a   : > { %v373_v32 = vadd.f32 %v367_v30, %v268_v29  ;;  %v885_v33 = vpop.f32.mrb[1].mxu0  ;;  %v507_v35 = vpop.f32.mrb[0].mxu1 }
 0x16b   : > { %v370_v36 = vpop.f32.mrb[2].mxu0  ;;  %v514_v37 = vadd.f32 %v507_v35, %v375_v31  ;;  %v509_v38 = vpop.f32.mrb[1].mxu1 }
 0x16c   : > { %374 = vst [vmem:[#allocation2] sm:$0xff] %v373_v32  ;;  %v886_v39 = vpop.f32.mrb[3].mxu0  ;;  %v515_v40 = vadd.f32 %v509_v38, %v376_v34  ;;  %v511_v41 = vpop.f32.mrb[2].mxu1 }
 0x16d   : > { %516 = vst [vmem:[#allocation3] sm:$0xff] %v514_v37  ;;  %v512_v42 = vpop.f32.mrb[3].mxu1 }
 0x16e   : > { %517 = vst [vmem:[#allocation3 + $0x8] sm:$0xff] %v515_v40 }
 0x173   : > { %v522_v43 = vld [vmem:[#allocation2] sm:$0xff] }
 0x174   : > { %888 = vmatpush3.xpose.msra.mxu0 %v522_v43  ;;  %v606_v55 = vld [vmem:[#allocation3] sm:$0xff] }
 0x175   : > { %v607_v54 = vld [vmem:[#allocation3 + $0x8] sm:$0xff] }
 0x176   : > { %611 = vmatprep.subr.mxu1 %v607_v54 }
 0x177   : > { %890 = vmatmul.mubr.f32.vlgmr.msra.gmra.mrb[0].mxu0 %v522_v43  ;;  %612 = vmatpush1.msra.mxu1 %v606_v55 }
 0x24a   : > { %v589_v45 = vpop.f32.mrb[0].mxu0 }
 0x24b   : > { %v593_v46 = vmul.f32 0.088388346, %v589_v45  ;;  %v891_v47 = vpop.f32.mrb[1].mxu0 }
 0x24d   : > { %v595_v48 = vsel %vm594_vm2, %v593_v46, -inf }
 0x24e   : > { %596 = vmax.xlane.f32.xlu0 %v595_v48 }
 0x2db   : > { %v597_v49 = vpop.xlane.xlu0 %596 }
 0x2dc   : > { %v598_v50 = vsub.f32 %v593_v46, %v597_v49 }
 0x2de   : > { %v599_v51 = vmul.f32 1.442695, %v598_v50 }
 0x2e0   : > { %1012 = vpow2.f32 %v599_v51 }
 0x2ea   : > { %v1013_v52 = vpop.eup %1012 }
 0x2eb   : > { %v601_v53 = vsel %vm594_vm2, %v1013_v52, 0.0 }
 0x2ec   : > { %602 = vadd.xlane.f32.xlu0 %v601_v53 }
 0x379   : > { %v603_v56 = vpop.xlane.xlu0 %602 }
 0x37a   : > { %1014 = vrcp.f32 %v603_v56 }
 0x384   : > { %v1015_v57 = vpop.eup %1014 }
 0x385   : > { %v605_v58 = vmul.f32 %v1015_v57, %v1013_v52 }
 0x387   : > { %848 = vmatmul.mubr.msk.f32.vlgmr.msra.gmra.mrb[0].mxu1 %vm594_vm2, %v605_v58 }
 0x45a   : > { %v677_v59 = vpop.f32.mrb[0].mxu1 }
 0x45b   : > { %v682_v61 = vmax.f32 %v677_v59, 0.0  ;;  %v679_v62 = vpop.f32.mrb[1].mxu1 }
 0x45c   : > { %v683_v0 = vmax.f32 %v679_v62, 0.0 }
 0x45d   : > { %v691_v1 = vadd.f32 %v689_v60, %v682_v61 }
 0x45e   : > { %v692_v2 = vadd.f32 %v690_v63, %v683_v0 }
 0x45f   : > { %693 = vst [vmem:[#allocation10] sm:$0xff] %v691_v1 }
 0x460   : > { %694 = vst [vmem:[#allocation10 + $0x8] sm:$0xff] %v692_v2 }
 0x461 PF: > { %p918_p1 = scmp.eq.s32.totalorder %s1313_s7, 1  ;;  %s1203_s15 = smov [#allocation10]  }
 0x462   : > { %s705_s23 = sshll.u32 %s1203_s15, 4  ;;  %s706_s23 = int_to_ptr.vmem [resolvable:$true] %s705_s23 }
 0x463   : > { %s1104_s25 = scalar_lea.vmem %s706_s23, 256  ;;  %p1111_p9 = scmp.lt.s32.totalorder %s706_s23, %s706_s23 }
 0x464   : > { %p1105_p6 = scmp.ne.s32.totalorder %s706_s23, %s1104_s25  ;;  %p1112_p12 = scmp.lt.s32.totalorder %s1104_s25, %s1104_s25 }
 0x466   : > { %p1106_p4 = pnand %p1105_p6, %p918_p1  ;;  %p1113_p10 = por %p1112_p12, %p1111_p9 }
 0x468   : > { %p1107_p7 = pneg %p1106_p4 }
 0x46a   : > { %p1114_p0 = pnand %p1113_p10, %p1107_p7 }
 0x46c   : > { %1117 = shalt.err (!%p1114_p0)
}
 0x46d   : > { %s1118_s28 = scalar_lea.hbm %s1483_s3, 256 }
 0x46e   : > { %p1119_p8 = scmp.ne.s32.totalorder %s1483_s3, %s1118_s28  ;;  %p1124_p3 = scmp.lt.u32.totalorder %s1118_s28, %s1483_s3 }
 0x470   : > { %p1120_p2 = pnand %p1119_p8, %p918_p1 }
 0x472   : > { %p1121_p13 = pneg %p1120_p2 }
 0x474   : > { %p1126_p5 = pnand %p1124_p3, %p1121_p13 }
 0x476   : > { %1129 = shalt.err (!%p1126_p5)
}
 0x477   : > { %901 = dma.vmem_to_hbm [thread:$0]  (%p918_p1), %s706_s23, 256, %s1483_s3, [#allocation6]  }
 0x478   : > { %1163 = dma.done.wait (%p918_p1), [#allocation6], 256  }
 0x479   : > { %1165 = vsyncadd (%p918_p1), [#allocation6], 4294967040 }
 0x47a PF: > { %s18_s17 = sadd.s32 1, %s1188_s17   ;;  %s1495_s12 = smov %s1172_s13 }
 0x47b   : > { %p15_p11 = scmp.ge.s32.totalorder %s18_s17, 4   ;;  %s1496_s13 = smov %s1176_s14 }
 0x47c   : > { %s1497_s14 = smov %s1268_s24  ;;  %s1498_s15 = smov %s1184_s16 }
 0x47d   : > { %s1499_s16 = smov %s1501_s18  ;;  %17 = sbr.rel (!%p15_p11) target bundleno = 6 (0x6), region = 96 }
 0x484   :  { %718 = vsyncpa [#allocation5], 1 }
 0x485   :  { %720 = vsyncpa [#allocation5 + $0x1], 1 }
 0x486   :  { %721 = vsyncpa [#allocation8], 1 }
 0x487   :  { %723 = vsyncpa [#allocation8 + $0x1], 1 }
 0x488   :  { %724 = vsyncpa [#allocation6], 1 }
 0x489   :  { %726 = vsyncpa [#allocation6 + $0x1], 1 }

</bundles_post_ra>
